<compile_context>
chip_gen: v7x
topology: tpu7x:2x2x1
jax: 0.10.0
libtpu: 0.0.40
codegen_flags: <defaults>
</compile_context>

<pallas_src>
import jax
import jax.numpy as jnp
from jax.experimental import pallas as pl
from jax.experimental.pallas import tpu as pltpu

EPS = 1e-5


# ----------------------------------------------------------------------------
# Kernel bodies
# ----------------------------------------------------------------------------
def _reduce_kernel(T, Hp):
    """conv_reduce (1x1) + per-tile BN partial stats + halo strip extraction."""
    def kernel(x_ref, w_ref, t_ref, st_ref, hf_ref, hl_ref):
        t = jnp.dot(w_ref[...], x_ref[...].astype(jnp.bfloat16),
                    preferred_element_type=jnp.float32)            # (D, T) f32
        t_ref[...] = t
        hf_ref[...] = t[None, :, :Hp]                               # head strip
        hl_ref[...] = t[None, :, T - Hp:]                           # tail strip
        s1 = jnp.sum(t, axis=1, keepdims=True)
        s2 = jnp.sum(t * t, axis=1, keepdims=True)
        st_ref[...] = jnp.concatenate([s1, s2], axis=1)[None]       # (1, D, 2)
    return kernel


def _grouped_kernel(H, W, T, Hp):
    """BN-reduce normalize + relu, grouped 3x3 conv (9 accumulating taps), stats."""
    rows_per_tile = T // W

    def kernel(t_ref, lh_ref, rh_ref, a_ref, b_ref, wt_ref, acc_ref, st_ref):
        # Tile plus one-image-row(+1px) halo per side, normalized / relu'd /
        # cast to bf16 once (rolls/slices and masks below all stay bf16).
        win = jnp.concatenate([lh_ref[0], t_ref[...], rh_ref[0]], axis=1)
        win = jnp.maximum(win * a_ref[...] + b_ref[...], 0.0).astype(jnp.bfloat16)

        # Hoisted boundary masks: one div/mod + 4 compares per tile (not per tap).
        lane = jax.lax.broadcasted_iota(jnp.int32, (1, T), 1)
        xq = lane % W
        yq = (pl.program_id(0) * rows_per_tile + lane // W) % H
        ymask = {-1: yq >= 1, 0: None, 1: yq <= H - 2}
        xmask = {-1: xq >= 1, 0: None, 1: xq <= W - 2}

        # TODO(synk): on v6e, fusing tap pairs into K=256 contractions would
        # better fill its 256-deep MXU; per-tap K=128 is optimal for v5e/v7x.
        acc = None
        for k in range(9):
            dy, dx = divmod(k, 3)
            dy -= 1
            dx -= 1
            start = Hp + dy * W + dx                  # in [0, 2*Hp], always valid
            src = win[:, start:start + T]             # (D, T) bf16, shifted tap input
            vm, hm = ymask[dy], xmask[dx]
            mask = vm if hm is None else (hm if vm is None else vm & hm)
            if mask is not None:
                src = jnp.where(mask, src, 0)         # bf16 select (zero padding)
            contrib = jnp.dot(wt_ref[k], src, preferred_element_type=jnp.float32)
            acc = contrib if acc is None else acc + contrib

        acc_ref[...] = acc
        s1 = jnp.sum(acc, axis=1, keepdims=True)
        s2 = jnp.sum(acc * acc, axis=1, keepdims=True)
        st_ref[...] = jnp.concatenate([s1, s2], axis=1)[None]
    return kernel


def _expand_kernel():
    """BN normalize + relu, conv_expand (1x1), partial stats of the output."""
    def kernel(acc_ref, a_ref, b_ref, w_ref, e_ref, st_ref):
        t2 = jnp.maximum(acc_ref[...] * a_ref[...] + b_ref[...],
                         0.0).astype(jnp.bfloat16)
        e = jnp.dot(w_ref[...], t2, preferred_element_type=jnp.float32)  # (Cin, T)
        e_ref[...] = e
        s1 = jnp.sum(e, axis=1, keepdims=True)
        s2 = jnp.sum(e * e, axis=1, keepdims=True)
        st_ref[...] = jnp.concatenate([s1, s2], axis=1)[None]
    return kernel


def _residual_kernel():
    """bn_expand normalize + residual add + relu (lane-dense f32 store)."""
    # TODO(synk): for v5e HBM-roofline relief the output slab could be bf16.
    def kernel(x_ref, e_ref, a_ref, b_ref, o_ref):
        o_ref[...] = jnp.maximum(x_ref[...] + e_ref[...] * a_ref[...] + b_ref[...],
                                 0.0)
    return kernel


# ----------------------------------------------------------------------------
# Wrapper
# ----------------------------------------------------------------------------
def _pick_lane_tile(N, H, W, max_lanes):
    """Largest tile of whole image rows with lane width a multiple of 128."""
    NHW, NR = N * H * W, N * H
    best = NHW                       # fallback: single tile (always spec-legal)
    for r in range(1, NR + 1):
        if NR % r:
            continue
        T = r * W
        if T > max_lanes:
            break
        if T % 128 == 0 and T >= W + 1:
            best = T
    return best


def _bn_affine(partial_stats, gamma, beta, count):
    """Reduce per-tile (sum, sumsq) and fold BN into per-channel scale/shift."""
    s = jnp.sum(partial_stats.astype(jnp.float32), axis=0)     # (C, 2)
    mean = s[:, 0:1] / count
    var = jnp.maximum(s[:, 1:2] / count - mean * mean, 0.0)    # cancellation guard
    a = gamma * jax.lax.rsqrt(var + EPS)
    b = beta - mean * a
    return a, b


def resnext_bottleneck(x_nchw, kparams, *, max_lane_tile=2048):
    """Forward of ResNeXtBottleneck. x_nchw: (N, dim, H, W) float32 (NCHW)."""
    (w_red, g_red, b_red, w_taps, g_bn, b_bn, w_exp, g_exp, b_exp) = kparams
    N, Cin, H, W = x_nchw.shape
    D = w_red.shape[0]
    NHW = N * H * W
    assert NHW >= W + 1
    T = _pick_lane_tile(N, H, W, max_lane_tile)
    nt = NHW // T
    Hp = W + 1                                   # halo pixels per side
    assert nt * T == NHW and T >= Hp

    # NCHW -> (C, N*H*W): channels on sublanes, flat pixels on the lane axis.
    x2d = jnp.transpose(x_nchw, (1, 0, 2, 3)).reshape(Cin, NHW).astype(jnp.float32)

    cp = pltpu.CompilerParams(
        dimension_semantics=("parallel",),       # tiles shard across v7x TCs
        vmem_limit_bytes=32 * 1024 * 1024,       # ample headroom over the slabs
    )

    # ---- pass 1: conv_reduce + BN-reduce partial stats + halo strips --------
    t_slab, st1, halo_first, halo_last = pl.pallas_call(
        _reduce_kernel(T, Hp),
        grid=(nt,),
        in_specs=[
            pl.BlockSpec((Cin, T), lambda i: (0, i)),        # x tile
            pl.BlockSpec((D, Cin), lambda i: (0, 0)),        # w_reduce (bf16)
        ],
        out_specs=[
            pl.BlockSpec((D, T), lambda i: (0, i)),          # t tile
            pl.BlockSpec((1, D, 2), lambda i: (i, 0, 0)),    # per-tile sum/sumsq
            pl.BlockSpec((1, D, Hp), lambda i: (i, 0, 0)),   # head halo strip
            pl.BlockSpec((1, D, Hp), lambda i: (i, 0, 0)),   # tail halo strip
        ],
        out_shape=[
            jax.ShapeDtypeStruct((D, NHW), jnp.float32),
            jax.ShapeDtypeStruct((nt, D, 2), jnp.float32),
            jax.ShapeDtypeStruct((nt, D, Hp), jnp.float32),
            jax.ShapeDtypeStruct((nt, D, Hp), jnp.float32),
        ],
        compiler_params=cp,
    )(x2d, w_red)

    a1, b1 = _bn_affine(st1, g_red, b_red, NHW)
    # Left halo of tile i = tail strip of tile i-1; right halo = head of tile i+1.
    # Wrapped entries at the global edges are only ever read at image-boundary-
    # masked positions, so their contents are irrelevant.
    lh = jnp.roll(halo_last, 1, axis=0)
    rh = jnp.roll(halo_first, -1, axis=0)

    # ---- pass 2: grouped 3x3 conv (BN-reduce normalize + relu fused in) -----
    acc_slab, st2 = pl.pallas_call(
        _grouped_kernel(H, W, T, Hp),
        grid=(nt,),
        in_specs=[
            pl.BlockSpec((D, T), lambda i: (0, i)),          # t tile
            pl.BlockSpec((1, D, Hp), lambda i: (i, 0, 0)),   # left halo
            pl.BlockSpec((1, D, Hp), lambda i: (i, 0, 0)),   # right halo
            pl.BlockSpec((D, 1), lambda i: (0, 0)),          # BN-reduce scale
            pl.BlockSpec((D, 1), lambda i: (0, 0)),          # BN-reduce shift
            pl.BlockSpec((9, D, D), lambda i: (0, 0, 0)),    # per-tap weights (bf16)
        ],
        out_specs=[
            pl.BlockSpec((D, T), lambda i: (0, i)),
            pl.BlockSpec((1, D, 2), lambda i: (i, 0, 0)),
        ],
        out_shape=[
            jax.ShapeDtypeStruct((D, NHW), jnp.float32),
            jax.ShapeDtypeStruct((nt, D, 2), jnp.float32),
        ],
        compiler_params=cp,
    )(t_slab, lh, rh, a1, b1, w_taps)

    a2, b2 = _bn_affine(st2, g_bn, b_bn, NHW)

    # ---- pass 3: conv_expand (BN normalize + relu fused in) -----------------
    e_slab, st3 = pl.pallas_call(
        _expand_kernel(),
        grid=(nt,),
        in_specs=[
            pl.BlockSpec((D, T), lambda i: (0, i)),          # grouped-conv tile
            pl.BlockSpec((D, 1), lambda i: (0, 0)),
            pl.BlockSpec((D, 1), lambda i: (0, 0)),
            pl.BlockSpec((Cin, D), lambda i: (0, 0)),        # w_expand (bf16)
        ],
        out_specs=[
            pl.BlockSpec((Cin, T), lambda i: (0, i)),
            pl.BlockSpec((1, Cin, 2), lambda i: (i, 0, 0)),
        ],
        out_shape=[
            jax.ShapeDtypeStruct((Cin, NHW), jnp.float32),
            jax.ShapeDtypeStruct((nt, Cin, 2), jnp.float32),
        ],
        compiler_params=cp,
    )(acc_slab, a2, b2, w_exp)

    a3, b3 = _bn_affine(st3, g_exp, b_exp, NHW)

    # ---- pass 4: bn_expand normalize + residual + relu ----------------------
    out2d = pl.pallas_call(
        _residual_kernel(),
        grid=(nt,),
        in_specs=[
            pl.BlockSpec((Cin, T), lambda i: (0, i)),        # x tile (residual)
            pl.BlockSpec((Cin, T), lambda i: (0, i)),        # expand output tile
            pl.BlockSpec((Cin, 1), lambda i: (0, 0)),
            pl.BlockSpec((Cin, 1), lambda i: (0, 0)),
        ],
        out_specs=pl.BlockSpec((Cin, T), lambda i: (0, i)),
        out_shape=jax.ShapeDtypeStruct((Cin, NHW), jnp.float32),
        compiler_params=cp,
    )(x2d, e_slab, a3, b3)

    return jnp.transpose(out2d.reshape(Cin, N, H, W), (1, 0, 2, 3))


# ----------------------------------------------------------------------------
# Deterministic parameter construction (PyTorch-layout weights, synthetic)
# ----------------------------------------------------------------------------
def init_torch_params(key, dim, cardinality=4, base_depth=32):
    D = cardinality * base_depth
    Dg = D // cardinality
    ks = jax.random.split(key, 9)
    w_reduce = 0.05 * jax.random.normal(ks[0], (D, dim, 1, 1), jnp.float32)   # OIHW
    w_grp = 0.05 * jax.random.normal(ks[1], (D, Dg, 3, 3), jnp.float32)       # OIHW grouped
    w_expand = 0.05 * jax.random.normal(ks[2], (dim, D, 1, 1), jnp.float32)   # OIHW
    g_red = 1.0 + 0.1 * jax.random.normal(ks[3], (D,), jnp.float32)
    b_red = 0.1 * jax.random.normal(ks[4], (D,), jnp.float32)
    g_bn = 1.0 + 0.1 * jax.random.normal(ks[5], (D,), jnp.float32)
    b_bn = 0.1 * jax.random.normal(ks[6], (D,), jnp.float32)
    g_exp = 1.0 + 0.1 * jax.random.normal(ks[7], (dim,), jnp.float32)
    b_exp = 0.1 * jax.random.normal(ks[8], (dim,), jnp.float32)
    return (w_reduce, w_grp, w_expand, g_red, b_red, g_bn, b_bn, g_exp, b_exp)


def to_kernel_params(tp, cardinality):
    (w_reduce, w_grp, w_expand, g_red, b_red, g_bn, b_bn, g_exp, b_exp) = tp
    D = w_reduce.shape[0]
    Dg = D // cardinality
    w_red = w_reduce[:, :, 0, 0]          # (D, dim)
    w_exp = w_expand[:, :, 0, 0]          # (dim, D)
    # Per-tap block-diagonal (out_ch, in_ch) weights, one (D, D) matrix per tap.
    # TODO(synk): 1 - 1/cardinality of each tap matrix is structural zeros; a
    # per-group batched dot would avoid the wasted MXU FLOPs (matters most at
    # high cardinality / on v5e) at the cost of per-group M=Dg underfilling the MXU.
    w_taps = jnp.zeros((9, D, D), jnp.float32)
    for k in range(9):
        ky, kx = divmod(k, 3)
        for g in range(cardinality):
            blk = w_grp[g * Dg:(g + 1) * Dg, :, ky, kx]        # (Dg_out, Dg_in)
            w_taps = w_taps.at[k, g * Dg:(g + 1) * Dg,
                               g * Dg:(g + 1) * Dg].set(blk)
    col = lambda v: v.reshape(-1, 1).astype(jnp.float32)
    bf = lambda v: v.astype(jnp.bfloat16)
    return (bf(w_red), col(g_red), col(b_red), bf(w_taps), col(g_bn), col(b_bn),
            bf(w_exp), col(g_exp), col(b_exp))


# ----------------------------------------------------------------------------
# Pure-JAX references (mirror the PyTorch forward) for validation
# ----------------------------------------------------------------------------
def reference_forward(x, tp, cardinality, matmul_dtype=jnp.float32):
    (w_reduce, w_grp, w_expand, g_red, b_red, g_bn, b_bn, g_exp, b_exp) = tp

    def conv(v, w, groups=1, pad=0):
        return jax.lax.conv_general_dilated(
            v.astype(matmul_dtype), w.astype(matmul_dtype), (1, 1),
            [(pad, pad), (pad, pad)],
            dimension_numbers=("NCHW", "OIHW", "NCHW"),
            feature_group_count=groups,
            preferred_element_type=jnp.float32)

    def bn(v, g, b):
        mean = v.mean(axis=(0, 2, 3), keepdims=True)
        var = ((v - mean) ** 2).mean(axis=(0, 2, 3), keepdims=True)
        return ((v - mean) / jnp.sqrt(var + EPS) * g.reshape(1, -1, 1, 1)
                + b.reshape(1, -1, 1, 1))

    t = conv(x, w_reduce)
    t = jax.nn.relu(bn(t, g_red, b_red))
    t = conv(t, w_grp, groups=cardinality, pad=1)
    t = jax.nn.relu(bn(t, g_bn, b_bn))
    t = conv(t, w_expand)
    t = bn(t, g_exp, b_exp)
    return jax.nn.relu(x + t)


if __name__ == "__main__":
    key = jax.random.PRNGKey(0)
    kx, kp = jax.random.split(key)

    N, dim, H, W = 2, 4, 16, 16
    cardinality, base_depth = 4, 32      # D = 128

    x = jax.random.normal(kx, (N, dim, H, W), jnp.float32)
    torch_params = init_torch_params(kp, dim, cardinality, base_depth)
    kparams = to_kernel_params(torch_params, cardinality)

    # Multi-tile path (4 lane tiles of 8 image rows -> exercises halos/masks at
    # both used and image-boundary seams) and single-tile fallback path.
    out_tiled = jax.block_until_ready(
        resnext_bottleneck(x, kparams, max_lane_tile=128))
    out_full = jax.block_until_ready(
        resnext_bottleneck(x, kparams, max_lane_tile=4096))

    ref_bf16 = reference_forward(x, torch_params, cardinality, jnp.bfloat16)
    ref_f32 = reference_forward(x, torch_params, cardinality, jnp.float32)

    for out in (out_tiled, out_full):
        assert out.shape == x.shape and out.dtype == jnp.float32
        # Numerics-matched reference (bf16 conv operands, f32 accumulation/BN).
        assert jnp.allclose(out, ref_bf16, atol=2e-3, rtol=2e-3), \
            "mismatch vs bf16-matched reference"
        # Full-f32 reference (module semantics); tolerance covers bf16 MXU operands.
        assert jnp.allclose(out, ref_f32, atol=2e-2, rtol=2e-2), \
            "mismatch vs f32 reference"

    print("KERNEL_OK")
</pallas_src>

<mosaic_0001>
module attributes {stable_mosaic.version = 11 : i64} {
  func.func @kernel(%arg0: i32, %arg1: memref<4x128xf32, #tpu.memory_space<vmem>>, %arg2: memref<128x4xbf16, #tpu.memory_space<vmem>>, %arg3: memref<128x128xf32, #tpu.memory_space<vmem>>, %arg4: memref<1x128x2xf32, #tpu.memory_space<vmem>>, %arg5: memref<1x128x17xf32, #tpu.memory_space<vmem>>, %arg6: memref<1x128x17xf32, #tpu.memory_space<vmem>>) attributes {dimension_semantics = [#tpu.dimension_semantics<parallel>], iteration_bounds = array<i64: 4>, scalar_prefetch = 0 : i64, scratch_operands = 0 : i64, tpu.core_type = #tpu.core_type<tc>, window_params = [{transform_indices = @transform_0, window_bounds = array<i64: 4, 128>}, {pipeline_mode = #tpu.pipeline_mode<synchronous>, transform_indices = @transform_1, window_bounds = array<i64: 128, 4>}, {transform_indices = @transform_2, window_bounds = array<i64: 128, 128>}, {transform_indices = @transform_3, window_bounds = array<i64: 1, 128, 2>}, {transform_indices = @transform_4, window_bounds = array<i64: 1, 128, 17>}, {transform_indices = @transform_5, window_bounds = array<i64: 1, 128, 17>}]} {
    %c0 = arith.constant 0 : index
    %c0_0 = arith.constant 0 : index
    %0 = vector.load %arg2[%c0, %c0_0] : memref<128x4xbf16, #tpu.memory_space<vmem>>, vector<128x4xbf16>
    %c0_1 = arith.constant 0 : index
    %c0_2 = arith.constant 0 : index
    %1 = vector.load %arg1[%c0_1, %c0_2] : memref<4x128xf32, #tpu.memory_space<vmem>>, vector<4x128xf32>
    %2 = arith.truncf %1 : vector<4x128xf32> to vector<4x128xbf16>
    %cst = arith.constant dense<0.000000e+00> : vector<128x128xf32>
    %3 = tpu.matmul %0, %2, %cst {dimension_numbers = #tpu.dot_dimension_numbers<[1], [0], [0], [1], [0, 0, 1, 1], [], []>} : vector<128x4xbf16>, vector<4x128xbf16>, vector<128x128xf32> -> vector<128x128xf32>
    %c0_3 = arith.constant 0 : index
    %c0_4 = arith.constant 0 : index
    %4 = vector.load %arg3[%c0_3, %c0_4] : memref<128x128xf32, #tpu.memory_space<vmem>>, vector<128x128xf32>
    tpu.vector_store %arg3[%c0_3, %c0_4], %3 {strides = array<i32>} : memref<128x128xf32, #tpu.memory_space<vmem>>, vector<128x128xf32>,
    %5 = vector.extract_strided_slice %3 {offsets = [0, 0], sizes = [128, 17], strides = [1, 1]} : vector<128x128xf32> to vector<128x17xf32>
    %6 = vector.shape_cast %5 : vector<128x17xf32> to vector<1x128x17xf32>
    %c0_5 = arith.constant 0 : index
    %c0_6 = arith.constant 0 : index
    %c0_7 = arith.constant 0 : index
    %7 = vector.load %arg5[%c0_5, %c0_6, %c0_7] : memref<1x128x17xf32, #tpu.memory_space<vmem>>, vector<1x128x17xf32>
    tpu.vector_store %arg5[%c0_5, %c0_6, %c0_7], %6 {strides = array<i32>} : memref<1x128x17xf32, #tpu.memory_space<vmem>>, vector<1x128x17xf32>,
    %8 = vector.extract_strided_slice %3 {offsets = [0, 111], sizes = [128, 17], strides = [1, 1]} : vector<128x128xf32> to vector<128x17xf32>
    %9 = vector.shape_cast %8 : vector<128x17xf32> to vector<1x128x17xf32>
    %c0_8 = arith.constant 0 : index
    %c0_9 = arith.constant 0 : index
    %c0_10 = arith.constant 0 : index
    %10 = vector.load %arg6[%c0_8, %c0_9, %c0_10] : memref<1x128x17xf32, #tpu.memory_space<vmem>>, vector<1x128x17xf32>
    tpu.vector_store %arg6[%c0_8, %c0_9, %c0_10], %9 {strides = array<i32>} : memref<1x128x17xf32, #tpu.memory_space<vmem>>, vector<1x128x17xf32>,
    %cst_11 = arith.constant dense<0.000000e+00> : vector<128xf32>
    %11 = vector.multi_reduction <add>, %3, %cst_11 [1] : vector<128x128xf32> to vector<128xf32>
    %12 = vector.shape_cast %11 : vector<128xf32> to vector<128x1xf32>
    %13 = arith.mulf %3, %3 : vector<128x128xf32>
    %cst_12 = arith.constant dense<0.000000e+00> : vector<128xf32>
    %14 = vector.multi_reduction <add>, %13, %cst_12 [1] : vector<128x128xf32> to vector<128xf32>
    %15 = vector.shape_cast %14 : vector<128xf32> to vector<128x1xf32>
    %16 = tpu.concatenate %12, %15 in 1 : vector<128x1xf32>, vector<128x1xf32> -> vector<128x2xf32>
    %17 = vector.shape_cast %16 : vector<128x2xf32> to vector<1x128x2xf32>
    %c0_13 = arith.constant 0 : index
    %c0_14 = arith.constant 0 : index
    %c0_15 = arith.constant 0 : index
    %18 = vector.load %arg4[%c0_13, %c0_14, %c0_15] : memref<1x128x2xf32, #tpu.memory_space<vmem>>, vector<1x128x2xf32>
    tpu.vector_store %arg4[%c0_13, %c0_14, %c0_15], %17 {strides = array<i32>} : memref<1x128x2xf32, #tpu.memory_space<vmem>>, vector<1x128x2xf32>,
    return
  }
  func.func @transform_0(%arg0: i32) -> (i32, i32) {
    %c0_i32 = arith.constant 0 : i32
    %c0_i32_0 = arith.constant 0 : i32
    return %c0_i32, %arg0 : i32, i32
  }
  func.func @transform_1(%arg0: i32) -> (i32, i32) {
    %c0_i32 = arith.constant 0 : i32
    %c0_i32_0 = arith.constant 0 : i32
    %c0_i32_1 = arith.constant 0 : i32
    return %c0_i32, %c0_i32_0 : i32, i32
  }
  func.func @transform_2(%arg0: i32) -> (i32, i32) {
    %c0_i32 = arith.constant 0 : i32
    %c0_i32_0 = arith.constant 0 : i32
    return %c0_i32, %arg0 : i32, i32
  }
  func.func @transform_3(%arg0: i32) -> (i32, i32, i32) {
    %c0_i32 = arith.constant 0 : i32
    %c0_i32_0 = arith.constant 0 : i32
    %c0_i32_1 = arith.constant 0 : i32
    return %arg0, %c0_i32, %c0_i32_0 : i32, i32, i32
  }
  func.func @transform_4(%arg0: i32) -> (i32, i32, i32) {
    %c0_i32 = arith.constant 0 : i32
    %c0_i32_0 = arith.constant 0 : i32
    %c0_i32_1 = arith.constant 0 : i32
    return %arg0, %c0_i32, %c0_i32_0 : i32, i32, i32
  }
  func.func @transform_5(%arg0: i32) -> (i32, i32, i32) {
    %c0_i32 = arith.constant 0 : i32
    %c0_i32_0 = arith.constant 0 : i32
    %c0_i32_1 = arith.constant 0 : i32
    return %arg0, %c0_i32, %c0_i32_0 : i32, i32, i32
  }
}

</mosaic_0001>

<bundles_post_ra>
// kernel: tpu_custom_call.1
= control target key start
LH: loop header
LB: loop body
LE: loop exit
PB: predicated region body
PF: predicated region fallthrough
CT: control target
= control target key end

     0   :  { %11 = vsyncpa [#allocation3], 0  ;;  %s1454_s0 = inlined_call_operand.vmem [shape: f32[4,512], index: 0, kind: input, shape index: {}]   ;;  %s1455_s1 = inlined_call_operand.vmem [shape: bf16[128,4], index: 1, kind: input, shape index: {}]   ;;  %s1456_s2 = inlined_call_operand.hbm [shape: f32[128,512], index: 2, kind: output, shape index: {0}]   ;;  %s1457_s3 = inlined_call_operand.vmem [shape: f32[4,128,2], index: 3, kind: output, shape index: {1}]   ;;  %s1458_s4 = inlined_call_operand.vmem [shape: f32[4,128,17], index: 4, kind: output, shape index: {2}]   ;;  %s1459_s5 = inlined_call_operand.vmem [shape: f32[4,128,17], index: 5, kind: output, shape index: {3}]  }
   0x1   :  { %13 = vsyncpa [#allocation3 + $0x1], 0  ;;  %s1059_s18 = smov 0   ;;  %s1061_s19 = smov 0  }
   0x2   :  { %s1063_s20 = smov 0   ;;  %s1065_s21 = smov 0  }
   0x3 LB: > { %s1080_s22 = sadd.s32 4294967295, %s1022_s21   ;;  %s843_s23 = sadd.s32 4294967294, %s1022_s21   ;;  %s1022_s21 = sphi %s1065_s21, %s1465_s21   ;;  %s1018_s20 = sphi %s1063_s20, %s1464_s20   ;;  %s1014_s19 = sphi %s1061_s19, %s1463_s19   ;;  %s1010_s18 = sphi %s1059_s18, %s1462_s18  }
   0x4   : > { %s1084_s24 = sadd.s32 1, %s1022_s21   ;;  %s73_s25 = sadd.s32 1, %s1018_s20 }
   0x5   : > { %s70_s26 = ssub.s32 %s1022_s21, %s1084_s24  ;;  %p83_p0 = scmp.ne.s32.totalorder %s1018_s20, %s1014_s19 }
   0x6   : > { %p71_p1 = scmp.eq.s32.totalorder %s70_s26, 0  ;;  %p84_p2 = scmp.eq.s32.totalorder %s1080_s22, 3 }
   0x7   : > { %p89_p3 = scmp.ne.s32.totalorder %s1014_s19, %s1010_s18  ;;  %p90_p4 = scmp.eq.s32.totalorder %s843_s23, 3 }
   0x8   : > { %s1095_s27 = scalar_select %p71_p1, %s1018_s20, %s73_s25  }
   0x9   : > { %p1097_p5 = por %p84_p2, %p83_p0  ;;  %p1101_p6 = por %p90_p4, %p89_p3 }
   0xa   : > { %p846_p7 = scmp.ge.s32.totalorder %s1022_s21, 1  ;;  %p196_p8 = scmp.lt.s32.totalorder %s1022_s21, 5 }
   0xc   : > { %p197_p9 = pnand %p846_p7, %p196_p8 }
   0xd   : > { %p238_p10 = scmp.lt.s32.totalorder (!%p197_p9), %s1080_s22, 3  ;;  %v952_v0 = vld [vmem:[%s1455_s1] sm:$0xff] (!%p197_p9)   ;;  %vm316_vm0 = vcmask (!%p197_p9), 31744   ;;  %vm341_vm1 = vcmask (!%p197_p9), 1041408   ;;  %v954_v5 = vld [vmem:[%s1455_s1 + $0x8] sm:$0xff] (!%p197_p9)   ;;  %v956_v7 = vld [vmem:[%s1455_s1 + $0x10] sm:$0xff] (!%p197_p9)  }
   0xe   : > { %200 = sbr.rel (%p197_p9) target bundleno = 688 (0x2b0), region = 28  ;;  %v953_v1 = vld [vmem:[%s1455_s1 + $0x20] sm:$0xff] (!%p197_p9)   ;;  %889 = vmatprep.mubr.msk.bf16.mxu0 (!%p197_p9), %vm316_vm0, %v952_v0  ;;  %v955_v6 = vld [vmem:[%s1455_s1 + $0x28] sm:$0xff] (!%p197_p9)   ;;  %v958_v8 = vld [vmem:[%s1455_s1 + $0x30] sm:$0xff] (!%p197_p9)   ;;  %s214_s11 = sand.u32 (!%p197_p9), 1, %s1014_s19   ;;  %vm458_vm2 = vcmask (!%p197_p9), 138240  }
   0xf   : > { %897 = vmatprep.mubr.msk.bf16.mxu1 (!%p197_p9), %vm316_vm0, %v953_v1  ;;  %v957_v9 = vld [vmem:[%s1455_s1 + $0x18] sm:$0xff] (!%p197_p9)   ;;  %vm635_vm3 = vcmask (!%p197_p9), 7168   ;;  %vm652_vm4 = vcmask (!%p197_p9), 15360   ;;  %s872_s9 = sshll.u32 (!%p197_p9), %s1080_s22, 7  ;;  %s1375_s15 = scalar_lea.sflag (!%p197_p9), [#allocation3], %s214_s11 }
  0x10   : > { %v959_v10 = vld [vmem:[%s1455_s1 + $0x38] sm:$0xff] (!%p197_p9)   ;;  %s1365_s14 = scalar_lea.hbm (!%p197_p9), %s1456_s2, %s872_s9 }
  0x15   : > { %s239_s7 = scalar_select %p238_p10, %s1080_s22, 3 }
  0x17   : > { %s848_s10 = sshll.u32 %s239_s7, 2  ;;  %s1145_s12 = sshll.u32 %s239_s7, 7 }
  0x18   : > { %s241_s13 = scalar_lea.vmem %s1454_s0, %s848_s10  ;;  %s1153_s16 = scalar_lea.vmem %s1458_s4, %s1145_s12 }
  0x19   : > { %v274_v2 = vld [vmem:[%s241_s13] sm:$0xf]  ;;  %s847_s13 = sshll.u32 %s214_s11, 7  ;;  %s1024_s7 = smov 17  }
  0x1a   : > { %v275_v3 = vpack.c.bf16 %v274_v2, %v274_v2  ;;  %s1155_s17 = scalar_lea.vmem [#allocation2], %s847_s13  ;;  %s1259_s26 = scalar_lea.vmem %s1459_s5, %s1145_s12 }
  0x1b   : > { %s1305_s8 = scalar_lea.vmem %s1457_s3, %s1145_s12  ;;  %s697_s10 = sshll.u32 %s1155_s17, 4  ;;  %s1367_s10 = int_to_ptr.vmem [resolvable:$true] %s697_s10 }
  0x1c   : > { %907 = vmatprep.subr.msk.bf16.mxu0 %vm341_vm1, %v275_v3  ;;  %908 = vmatprep.subr.msk.bf16.mxu1 %vm341_vm1, %v275_v3  ;;  %v343_v4 = vsel %vm341_vm1, %v275_v3, 0  ;;  %s960_s22 = scalar_lea.vmem %s1367_s10, 2048 }
  0x1d   : > { %888 = vmatpush3.bf16.msra.mxu0 %v343_v4  ;;  %906 = vmatpush3.bf16.msra.mxu1 %v343_v4  ;;  %p961_p11 = scmp.ne.s32.totalorder %s1367_s10, %s960_s22 }
  0x1f   : > { %p962_p12 = pnand %p961_p11, %p1097_p5 }
  0x20   : > { %890 = vmatmul.mubr.msk.bf16.vlgmr.msra.gmra.mrb[0].mxu0 %vm316_vm0, %v954_v5  ;;  %898 = vmatmul.mubr.msk.bf16.vlgmr.msra.gmra.mrb[0].mxu1 %vm316_vm0, %v955_v6 }
  0x21   : > { %893 = vmatprep.mubr.msk.bf16.mxu0 %vm316_vm0, %v956_v7  ;;  %901 = vmatprep.mubr.msk.bf16.mxu1 %vm316_vm0, %v958_v8  ;;  %p963_p13 = pneg %p962_p12 }
  0x28   : > { %894 = vmatmul.mubr.msk.bf16.gmra.mrb[4].mxu0 %vm316_vm0, %v957_v9  ;;  %902 = vmatmul.mubr.msk.bf16.gmra.mrb[4].mxu1 %vm316_vm0, %v959_v10 }
  0xf3   : > { %v891_v11 = vpop.f32.mrb[0].mxu0  ;;  %v899_v12 = vpop.f32.mrb[0].mxu1 }
  0xf4   : > { %444 = vst [vmem:[%s1155_s17 + $0x10] sm:$0xff] %v891_v11  ;;  %461 = vst.msk [vmem:[%s1153_s16 + $0x10] sm:$0xff] %vm458_vm2, %v891_v11  ;;  %511 = vrot.lane.b32.xlu0 %v899_v12, %s1024_s7  ;;  %495 = vrot.lane.b32.xlu1 %v891_v11, %s1024_s7  ;;  %v1165_v13 = vpop.f32.mrb[1].mxu0  ;;  %v1167_v14 = vpop.f32.mrb[1].mxu1  ;;  %v589_v27 = vmul.f32 %v891_v11, %v891_v11  ;;  %v597_v28 = vmul.f32 %v899_v12, %v899_v12 }
  0xf5   : > { %452 = vst [vmem:[%s1155_s17 + $0x50] sm:$0xff] %v899_v12  ;;  %469 = vst.msk [vmem:[%s1153_s16 + $0x50] sm:$0xff] %vm458_vm2, %v899_v12  ;;  %v892_v15 = vpop.f32.mrb[2].mxu0  ;;  %v900_v16 = vpop.f32.mrb[2].mxu1  ;;  %v587_v33 = vmul.f32 %v1165_v13, %v1165_v13  ;;  %v595_v35 = vmul.f32 %v1167_v14, %v1167_v14 }
  0xf6   : > { %442 = vst [vmem:[%s1155_s17] sm:$0xff] %v1165_v13  ;;  %459 = vst.msk [vmem:[%s1153_s16] sm:$0xff] %vm458_vm2, %v1165_v13  ;;  %v382_v17 = vpop.f32.mrb[3].mxu0  ;;  %v414_v18 = vpop.f32.mrb[3].mxu1  ;;  %v590_v31 = vmul.f32 %v892_v15, %v892_v15  ;;  %v598_v32 = vmul.f32 %v900_v16, %v900_v16 }
  0xf7   : > { %450 = vst [vmem:[%s1155_s17 + $0x40] sm:$0xff] %v1167_v14  ;;  %467 = vst.msk [vmem:[%s1153_s16 + $0x40] sm:$0xff] %vm458_vm2, %v1167_v14  ;;  %v588_v34 = vmul.f32 %v382_v17, %v382_v17  ;;  %v596_v36 = vmul.f32 %v414_v18, %v414_v18 }
  0xf8   : > { %445 = vst [vmem:[%s1155_s17 + $0x18] sm:$0xff] %v892_v15  ;;  %462 = vst.msk [vmem:[%s1153_s16 + $0x18] sm:$0xff] %vm458_vm2, %v892_v15 }
  0xf9   : > { %453 = vst [vmem:[%s1155_s17 + $0x58] sm:$0xff] %v900_v16  ;;  %470 = vst.msk [vmem:[%s1153_s16 + $0x58] sm:$0xff] %vm458_vm2, %v900_v16 }
  0xfa   : > { %443 = vst [vmem:[%s1155_s17 + $0x8] sm:$0xff] %v382_v17  ;;  %460 = vst.msk [vmem:[%s1153_s16 + $0x8] sm:$0xff] %vm458_vm2, %v382_v17 }
  0xfb   : > { %451 = vst [vmem:[%s1155_s17 + $0x48] sm:$0xff] %v414_v18  ;;  %468 = vst.msk [vmem:[%s1153_s16 + $0x48] sm:$0xff] %vm458_vm2, %v414_v18  ;;  %v1191_v19 = vpop.f32.mrb[4].mxu0  ;;  %v1214_v23 = vpop.f32.mrb[4].mxu1 }
  0xfc   : > { %448 = vst [vmem:[%s1155_s17 + $0x30] sm:$0xff] %v1191_v19  ;;  %465 = vst.msk [vmem:[%s1153_s16 + $0x30] sm:$0xff] %vm458_vm2, %v1191_v19  ;;  %v1198_v20 = vpop.f32.mrb[5].mxu0  ;;  %v1226_v24 = vpop.f32.mrb[5].mxu1  ;;  %v593_v46 = vmul.f32 %v1191_v19, %v1191_v19  ;;  %v601_v1 = vmul.f32 %v1214_v23, %v1214_v23 }
  0xfd   : > { %446 = vst [vmem:[%s1155_s17 + $0x20] sm:$0xff] %v1198_v20  ;;  %463 = vst.msk [vmem:[%s1153_s16 + $0x20] sm:$0xff] %vm458_vm2, %v1198_v20  ;;  %v1205_v21 = vpop.f32.mrb[6].mxu0  ;;  %v1233_v25 = vpop.f32.mrb[6].mxu1  ;;  %v591_v59 = vmul.f32 %v1198_v20, %v1198_v20  ;;  %v599_v61 = vmul.f32 %v1226_v24, %v1226_v24 }
  0xfe   : > { %449 = vst [vmem:[%s1155_s17 + $0x38] sm:$0xff] %v1205_v21  ;;  %466 = vst.msk [vmem:[%s1153_s16 + $0x38] sm:$0xff] %vm458_vm2, %v1205_v21  ;;  %v1212_v22 = vpop.f32.mrb[7].mxu0  ;;  %v1241_v26 = vpop.f32.mrb[7].mxu1  ;;  %v594_v53 = vmul.f32 %v1205_v21, %v1205_v21  ;;  %v602_v57 = vmul.f32 %v1233_v25, %v1233_v25 }
  0xff   : > { %447 = vst [vmem:[%s1155_s17 + $0x28] sm:$0xff] %v1212_v22  ;;  %464 = vst.msk [vmem:[%s1153_s16 + $0x28] sm:$0xff] %vm458_vm2, %v1212_v22  ;;  %v592_v55 = vmul.f32 %v1212_v22, %v1212_v22  ;;  %v600_v56 = vmul.f32 %v1241_v26, %v1241_v26 }
 0x100   : > { %456 = vst [vmem:[%s1155_s17 + $0x70] sm:$0xff] %v1214_v23  ;;  %473 = vst.msk [vmem:[%s1153_s16 + $0x70] sm:$0xff] %vm458_vm2, %v1214_v23 }
 0x101   : > { %454 = vst [vmem:[%s1155_s17 + $0x60] sm:$0xff] %v1226_v24  ;;  %471 = vst.msk [vmem:[%s1153_s16 + $0x60] sm:$0xff] %vm458_vm2, %v1226_v24 }
 0x102   : > { %457 = vst [vmem:[%s1155_s17 + $0x78] sm:$0xff] %v1233_v25  ;;  %474 = vst.msk [vmem:[%s1153_s16 + $0x78] sm:$0xff] %vm458_vm2, %v1233_v25 }
 0x103   : > { %455 = vst [vmem:[%s1155_s17 + $0x68] sm:$0xff] %v1241_v26  ;;  %472 = vst.msk [vmem:[%s1153_s16 + $0x68] sm:$0xff] %vm458_vm2, %v1241_v26  ;;  %s1025_s16 = smov [#allocation2]  }
 0x104   : > { %s964_s17 = sshll.u32 %s1025_s16, 4  ;;  %s965_s17 = int_to_ptr.vmem [resolvable:$false] %s964_s17 }
 0x105   : > { %p967_p0 = scmp.lt.s32.totalorder %s1367_s10, %s965_s17 }
 0x113   : > { %559 = vadd.xlane.f32.xlu0 %v891_v11 }
 0x118   : > { %575 = vadd.xlane.f32.xlu1 %v899_v12 }
 0x11c   : > { %571 = vadd.xlane.f32.xlu1 %v1167_v14 }
 0x129   : > { %491 = vrot.lane.b32.xlu0 %v1165_v13, %s1024_s7 }
 0x12d   : > { %507 = vrot.lane.b32.xlu0 %v1167_v14, %s1024_s7  ;;  %497 = vrot.lane.b32.xlu1 %v892_v15, %s1024_s7 }
 0x131   : > { %513 = vrot.lane.b32.xlu1 %v900_v16, %s1024_s7 }
 0x14c   : > { %555 = vadd.xlane.f32.xlu0 %v1165_v13 }
 0x150   : > { %561 = vadd.xlane.f32.xlu0 %v892_v15 }
 0x154   : > { %577 = vadd.xlane.f32.xlu0 %v900_v16 }
 0x155   : > { %607 = vadd.xlane.f32.xlu1 %v589_v27 }
 0x159   : > { %623 = vadd.xlane.f32.xlu1 %v597_v28 }
 0x166   : > { %v496_v29 = vpop.permute.xlu1 %495  ;;  %v512_v30 = vpop.permute.xlu0 %511 }
 0x167   : > { %541 = vst.msk [vmem:[%s1259_s26 + $0x10] sm:$0xff] %vm458_vm2, %v496_v29  ;;  %549 = vst.msk [vmem:[%s1259_s26 + $0x50] sm:$0xff] %vm458_vm2, %v512_v30 }
 0x16a   : > { %509 = vrot.lane.b32.xlu1 %v414_v18, %s1024_s7  ;;  %493 = vrot.lane.b32.xlu0 %v382_v17, %s1024_s7 }
 0x189   : > { %573 = vadd.xlane.f32.xlu0 %v414_v18 }
 0x18d   : > { %609 = vadd.xlane.f32.xlu0 %v590_v31 }
 0x18e   : > { %557 = vadd.xlane.f32.xlu1 %v382_v17 }
 0x191   : > { %625 = vadd.xlane.f32.xlu0 %v598_v32 }
 0x192   : > { %603 = vadd.xlane.f32.xlu1 %v587_v33 }
 0x195   : > { %605 = vadd.xlane.f32.xlu0 %v588_v34 }
 0x196   : > { %619 = vadd.xlane.f32.xlu1 %v595_v35 }
 0x199   : > { %621 = vadd.xlane.f32.xlu0 %v596_v36 }
 0x19a   : > { %567 = vadd.xlane.f32.xlu1 %v1191_v19 }
 0x19e   : > { %583 = vadd.xlane.f32.xlu1 %v1214_v23 }
 0x1a0   : > { %v560_v37 = vpop.xlane.xlu0 %559 }
 0x1a2   : > { %563 = vadd.xlane.f32.xlu1 %v1198_v20 }
 0x1a4   : > { %v492_v38 = vpop.permute.xlu0 %491 }
 0x1a5   : > { %539 = vst.msk [vmem:[%s1259_s26] sm:$0xff] %vm458_vm2, %v492_v38  ;;  %v576_v39 = vpop.xlane.xlu1 %575 }
 0x1a6   : > { %579 = vadd.xlane.f32.xlu1 %v1226_v24 }
 0x1a8   : > { %v508_v40 = vpop.permute.xlu0 %507 }
 0x1a9   : > { %547 = vst.msk [vmem:[%s1259_s26 + $0x40] sm:$0xff] %vm458_vm2, %v508_v40  ;;  %v1279_v41 = vpop.xlane.xlu1 %571 }
 0x1ad   : > { %v498_v42 = vpop.permute.xlu1 %497 }
 0x1ae   : > { %542 = vst.msk [vmem:[%s1259_s26 + $0x18] sm:$0xff] %vm458_vm2, %v498_v42 }
 0x1af   : > { %503 = vrot.lane.b32.xlu0 %v1191_v19, %s1024_s7 }
 0x1b1   : > { %v514_v43 = vpop.permute.xlu1 %513 }
 0x1b2   : > { %550 = vst.msk [vmem:[%s1259_s26 + $0x58] sm:$0xff] %vm458_vm2, %v514_v43 }
 0x1b3   : > { %519 = vrot.lane.b32.xlu0 %v1214_v23, %s1024_s7 }
 0x1b7   : > { %499 = vrot.lane.b32.xlu0 %v1198_v20, %s1024_s7  ;;  %505 = vrot.lane.b32.xlu1 %v1205_v21, %s1024_s7 }
 0x1bb   : > { %515 = vrot.lane.b32.xlu0 %v1226_v24, %s1024_s7  ;;  %521 = vrot.lane.b32.xlu1 %v1233_v25, %s1024_s7 }
 0x1d9   : > { %v556_v44 = vpop.xlane.xlu0 %555 }
 0x1da   : > { %569 = vadd.xlane.f32.xlu0 %v1205_v21 }
 0x1dd   : > { %v562_v45 = vpop.xlane.xlu0 %561 }
 0x1de   : > { %585 = vadd.xlane.f32.xlu0 %v1233_v25 }
 0x1df   : > { %615 = vadd.xlane.f32.xlu1 %v593_v46 }
 0x1e1   : > { %v578_v47 = vpop.xlane.xlu0 %577 }
 0x1e2   : > { %v608_v48 = vpop.xlane.xlu1 %607  ;;  %565 = vadd.xlane.f32.xlu0 %v1212_v22 }
 0x1e3   : > { %v638_v49 = vsel %vm635_vm3, %v560_v37, %v608_v48 }
 0x1e4   : > { %655 = vst.msk [vmem:[%s1305_s8 + $0x10] sm:$0xff] %vm652_vm4, %v638_v49 }
 0x1e5   : > { %v494_v50 = vpop.permute.xlu0 %493 }
 0x1e6   : > { %540 = vst.msk [vmem:[%s1259_s26 + $0x8] sm:$0xff] %vm458_vm2, %v494_v50  ;;  %v624_v51 = vpop.xlane.xlu1 %623  ;;  %581 = vadd.xlane.f32.xlu0 %v1241_v26 }
 0x1e7   : > { %v646_v52 = vsel %vm635_vm3, %v576_v39, %v624_v51 }
 0x1e8   : > { %663 = vst.msk [vmem:[%s1305_s8 + $0x50] sm:$0xff] %vm652_vm4, %v646_v52 }
 0x1ea   : > { %v510_v54 = vpop.permute.xlu1 %509  ;;  %617 = vadd.xlane.f32.xlu0 %v594_v53 }
 0x1eb   : > { %548 = vst.msk [vmem:[%s1259_s26 + $0x48] sm:$0xff] %vm458_vm2, %v510_v54 }
 0x1ee   : > { %613 = vadd.xlane.f32.xlu0 %v592_v55 }
 0x1f0   : > { %501 = vrot.lane.b32.xlu1 %v1212_v22, %s1024_s7 }
 0x1f2   : > { %629 = vadd.xlane.f32.xlu0 %v600_v56 }
 0x1f4   : > { %517 = vrot.lane.b32.xlu1 %v1241_v26, %s1024_s7  ;;  %s966_s7 = scalar_lea.vmem %s965_s17, 4096 }
 0x1f5   : > { %p968_p1 = scmp.lt.s32.totalorder %s966_s7, %s960_s22 }
 0x1f6   : > { %633 = vadd.xlane.f32.xlu0 %v602_v57 }
 0x1f7   : > { %p969_p2 = por %p968_p1, %p967_p0 }
 0x1f9   : > { %p970_p3 = pnand %p969_p2, %p963_p13 }
 0x216   : > { %v574_v58 = vpop.xlane.xlu0 %573 }
 0x218   : > { %611 = vadd.xlane.f32.xlu1 %v591_v59 }
 0x21a   : > { %v610_v60 = vpop.xlane.xlu0 %609 }
 0x21b   : > { %v639_v62 = vsel %vm635_vm3, %v562_v45, %v610_v60  ;;  %v558_v63 = vpop.xlane.xlu1 %557 }
 0x21c   : > { %656 = vst.msk [vmem:[%s1305_s8 + $0x18] sm:$0xff] %vm652_vm4, %v639_v62  ;;  %627 = vadd.xlane.f32.xlu1 %v599_v61 }
 0x21e   : > { %v626_v0 = vpop.xlane.xlu0 %625 }
 0x21f   : > { %v647_v2 = vsel %vm635_vm3, %v578_v47, %v626_v0  ;;  %v604_v3 = vpop.xlane.xlu1 %603 }
 0x220   : > { %664 = vst.msk [vmem:[%s1305_s8 + $0x58] sm:$0xff] %vm652_vm4, %v647_v2  ;;  %v636_v4 = vsel %vm635_vm3, %v556_v44, %v604_v3  ;;  %631 = vadd.xlane.f32.xlu1 %v601_v1 }
 0x221   : > { %653 = vst.msk [vmem:[%s1305_s8] sm:$0xff] %vm652_vm4, %v636_v4 }
 0x222   : > { %v606_v5 = vpop.xlane.xlu0 %605 }
 0x223   : > { %v637_v6 = vsel %vm635_vm3, %v558_v63, %v606_v5  ;;  %v620_v7 = vpop.xlane.xlu1 %619 }
 0x224   : > { %654 = vst.msk [vmem:[%s1305_s8 + $0x8] sm:$0xff] %vm652_vm4, %v637_v6  ;;  %v644_v8 = vsel %vm635_vm3, %v1279_v41, %v620_v7 }
 0x225   : > { %661 = vst.msk [vmem:[%s1305_s8 + $0x40] sm:$0xff] %vm652_vm4, %v644_v8 }
 0x226   : > { %v622_v9 = vpop.xlane.xlu0 %621 }
 0x227   : > { %v645_v10 = vsel %vm635_vm3, %v574_v58, %v622_v9  ;;  %v568_v11 = vpop.xlane.xlu1 %567 }
 0x228   : > { %662 = vst.msk [vmem:[%s1305_s8 + $0x48] sm:$0xff] %vm652_vm4, %v645_v10 }
 0x22a   : > { %v504_v12 = vpop.permute.xlu0 %503 }
 0x22b   : > { %545 = vst.msk [vmem:[%s1259_s26 + $0x30] sm:$0xff] %vm458_vm2, %v504_v12  ;;  %v1358_v13 = vpop.xlane.xlu1 %583 }
 0x22e   : > { %v520_v14 = vpop.permute.xlu0 %519 }
 0x22f   : > { %553 = vst.msk [vmem:[%s1259_s26 + $0x70] sm:$0xff] %vm458_vm2, %v520_v14  ;;  %v1371_v15 = vpop.xlane.xlu1 %563 }
 0x230   : > { %973 = shalt.err (!%p970_p3)
}
 0x231   : > { %s974_s11 = scalar_lea.hbm %s1365_s14, 2048  ;;  %s978_s30 = scalar_lea.hbm %s1456_s2, 8192 }
 0x232   : > { %p975_p4 = scmp.ne.s32.totalorder %s1365_s14, %s974_s11  ;;  %p979_p9 = scmp.lt.u32.totalorder %s1365_s14, %s1456_s2 }
 0x233   : > { %p980_p10 = scmp.lt.u32.totalorder %s978_s30, %s974_s11  ;;  %p982_p12 = scmp.lt.u32.totalorder %s974_s11, %s1365_s14 }
 0x234   : > { %p976_p7 = pnand %p975_p4, %p1097_p5 }
 0x235   : > { %p981_p11 = por %p980_p10, %p979_p9 }
 0x236   : > { %p977_p8 = pneg %p976_p7 }
 0x237   : > { %p983_p13 = por %p982_p12, %p981_p11 }
 0x239   : > { %p984_p0 = pnand %p983_p13, %p977_p8 }
 0x23b   : > { %987 = shalt.err (!%p984_p0)
}
 0x23c   : > { %s1026_s12 = smov 128   ;;  %s1027_s13 = smov 512   ;;  %v500_v16 = vpop.permute.xlu0 %499  ;;  %v580_v17 = vpop.xlane.xlu1 %579 }
 0x23d   : > { %s1028_s22 = smov 8   ;;  %543 = vst.msk [vmem:[%s1259_s26 + $0x20] sm:$0xff] %vm458_vm2, %v500_v16 }
 0x23e   : > { %909 = dma.vmem_to_hbm [thread:$0]  (%p1097_p5), %s1367_s10, 2048, %s1365_s14, %s1375_s15, %s1026_s12, %s1027_s13, %s1028_s22  }
 0x240   : > { %v516_v18 = vpop.permute.xlu0 %515  ;;  %v506_v19 = vpop.permute.xlu1 %505 }
 0x241   : > { %551 = vst.msk [vmem:[%s1259_s26 + $0x60] sm:$0xff] %vm458_vm2, %v516_v18  ;;  %546 = vst.msk [vmem:[%s1259_s26 + $0x38] sm:$0xff] %vm458_vm2, %v506_v19 }
 0x244   : > { %v522_v20 = vpop.permute.xlu1 %521 }
 0x245   : > { %554 = vst.msk [vmem:[%s1259_s26 + $0x78] sm:$0xff] %vm458_vm2, %v522_v20 }
 0x267   : > { %v570_v21 = vpop.xlane.xlu0 %569 }
 0x26b   : > { %v586_v22 = vpop.xlane.xlu0 %585 }
 0x26c   : > { %v616_v23 = vpop.xlane.xlu1 %615 }
 0x26d   : > { %v642_v24 = vsel %vm635_vm3, %v568_v11, %v616_v23 }
 0x26e   : > { %659 = vst.msk [vmem:[%s1305_s8 + $0x30] sm:$0xff] %vm652_vm4, %v642_v24 }
 0x26f   : > { %v566_v25 = vpop.xlane.xlu0 %565 }
 0x270   : > { %v502_v26 = vpop.permute.xlu1 %501 }
 0x271   : > { %544 = vst.msk [vmem:[%s1259_s26 + $0x28] sm:$0xff] %vm458_vm2, %v502_v26 }
 0x273   : > { %v582_v27 = vpop.xlane.xlu0 %581 }
 0x274   : > { %v518_v28 = vpop.permute.xlu1 %517 }
 0x275   : > { %552 = vst.msk [vmem:[%s1259_s26 + $0x68] sm:$0xff] %vm458_vm2, %v518_v28 }
 0x277   : > { %v618_v29 = vpop.xlane.xlu0 %617 }
 0x278   : > { %v643_v30 = vsel %vm635_vm3, %v570_v21, %v618_v29 }
 0x279   : > { %660 = vst.msk [vmem:[%s1305_s8 + $0x38] sm:$0xff] %vm652_vm4, %v643_v30 }
 0x27b   : > { %v614_v31 = vpop.xlane.xlu0 %613 }
 0x27c   : > { %v641_v32 = vsel %vm635_vm3, %v566_v25, %v614_v31 }
 0x27d   : > { %658 = vst.msk [vmem:[%s1305_s8 + $0x28] sm:$0xff] %vm652_vm4, %v641_v32 }
 0x27f   : > { %v630_v33 = vpop.xlane.xlu0 %629 }
 0x280   : > { %v649_v34 = vsel %vm635_vm3, %v582_v27, %v630_v33 }
 0x281   : > { %666 = vst.msk [vmem:[%s1305_s8 + $0x68] sm:$0xff] %vm652_vm4, %v649_v34 }
 0x283   : > { %v634_v35 = vpop.xlane.xlu0 %633 }
 0x284   : > { %v651_v36 = vsel %vm635_vm3, %v586_v22, %v634_v35 }
 0x285   : > { %668 = vst.msk [vmem:[%s1305_s8 + $0x78] sm:$0xff] %vm652_vm4, %v651_v36 }
 0x2a5   : > { %v612_v37 = vpop.xlane.xlu1 %611 }
 0x2a6   : > { %v640_v38 = vsel %vm635_vm3, %v1371_v15, %v612_v37 }
 0x2a7   : > { %657 = vst.msk [vmem:[%s1305_s8 + $0x20] sm:$0xff] %vm652_vm4, %v640_v38 }
 0x2a9   : > { %v628_v39 = vpop.xlane.xlu1 %627 }
 0x2aa   : > { %v648_v40 = vsel %vm635_vm3, %v580_v17, %v628_v39 }
 0x2ab   : > { %665 = vst.msk [vmem:[%s1305_s8 + $0x60] sm:$0xff] %vm652_vm4, %v648_v40 }
 0x2ad   : > { %v632_v41 = vpop.xlane.xlu1 %631 }
 0x2ae   : > { %v650_v42 = vsel %vm635_vm3, %v1358_v13, %v632_v41 }
 0x2af   : > { %667 = vst.msk [vmem:[%s1305_s8 + $0x70] sm:$0xff] %vm652_vm4, %v650_v42 }
 0x2b0 PF: > { %p915_p5 = scmp.ge.s32.totalorder %s1022_s21, 2  ;;  %s721_s28 = sand.u32 1, %s1010_s18  }
 0x2b1   : > { %s722_s26 = scalar_lea.sflag [#allocation3], %s721_s28 }
 0x2b2   : > { %p912_p1 = pnand %p915_p5, %p1101_p6 }
 0x2b4   : > { %1005 = dma.done.wait (!%p912_p1), %s722_s26, 2048  }
 0x2b5   : > { %1007 = vsyncadd (!%p912_p1), %s722_s26, 4294965248  ;;  %p16_p2 = scmp.ge.s32.totalorder %s1084_s24, 6   ;;  %s1462_s18 = smov %s1014_s19 }
 0x2b6   : > { %s1463_s19 = smov %s1018_s20  ;;  %s1464_s20 = smov %s1095_s27 }
 0x2b7   : > { %s1465_s21 = smov %s1084_s24  ;;  %18 = sbr.rel (!%p16_p2) target bundleno = 3 (0x3), region = 99 }
 0x2be   :  { %751 = vsyncpa [#allocation3], 1 }
 0x2bf   :  { %753 = vsyncpa [#allocation3 + $0x1], 1 }

</bundles_post_ra>
